<compile_context>
chip_gen: v7x
topology: tpu7x:2x2x1
jax: 0.10.0
libtpu: 0.0.40
codegen_flags: <defaults>
</compile_context>

<pallas_src>
import math

import jax
import jax.numpy as jnp
from jax import lax
from jax.experimental import pallas as pl
from jax.experimental.pallas import tpu as pltpu

_EPS = 1e-5


# ----------------------------------------------------------------------------
# Pallas kernel: 4 chained channel matmuls (1x1 convs) with folded BN/bias.
# Activations are (channels, pixels); pixels are the lane dimension.
# ----------------------------------------------------------------------------
def _make_encoder_kernel(cin):
    def kernel(x_ref,
               w1_ref, sh1_ref,
               w2_ref, sh2_ref,
               w3_ref, sh3_ref,
               w4_ref, b4_ref,
               o_ref):
        x = x_ref[...]                               # (Cin, PIX_TILE) f32

        # --- block1: conv(+bias) + BN folded into (W', shift'), then ReLU ---
        if cin <= 8:
            # Tiny K: sum of VPU broadcast outer products (f32 weights);
            # skips an MXU push/pop round-trip for <=8 useful MACs per lane.
            w1 = w1_ref[...]                         # (C1, Cin) f32
            h = w1[:, 0:1] * x[0:1, :]
            for c in range(1, cin):
                h = h + w1[:, c:c + 1] * x[c:c + 1, :]
        else:
            # bf16 feed, f32 accumulate (single MXU pass).
            h = jnp.dot(w1_ref[...], x.astype(w1_ref.dtype),
                        preferred_element_type=jnp.float32)
        h = jnp.maximum(h + sh1_ref[...], 0.0)       # (C1, PIX_TILE) f32

        # --- block2: bf16 feeds, f32 accumulation ---
        h = jnp.dot(w2_ref[...], h.astype(w2_ref.dtype),
                    preferred_element_type=jnp.float32)
        h = jnp.maximum(h + sh2_ref[...], 0.0)       # (C2, PIX_TILE)

        # --- block3 ---
        h = jnp.dot(w3_ref[...], h.astype(w3_ref.dtype),
                    preferred_element_type=jnp.float32)
        h = jnp.maximum(h + sh3_ref[...], 0.0)       # (C3, PIX_TILE)

        # --- final_conv: conv + bias only (no BN, no ReLU) ---
        y = jnp.dot(w4_ref[...], h.astype(w4_ref.dtype),
                    preferred_element_type=jnp.float32)
        o_ref[...] = (y + b4_ref[...]).astype(o_ref.dtype)   # (C4, PIX_TILE)

    return kernel


def _pick_pixel_tile(n_pixels, cap=4096):
    """Largest lane-dense (multiple-of-128) pixel tile, at most `cap`.

    Prefers an exact divisor of the per-image pixel count (no ragged block,
    fully unmasked stores).  Otherwise returns the largest multiple of 128
    that fits; the last grid block is ragged and Pallas clips its writeback,
    so no host-side padding or post-kernel slice is ever needed.
    """
    best_div = 0
    t = 128
    while t <= min(cap, n_pixels):
        if n_pixels % t == 0:
            best_div = t
        t += 128
    if best_div:
        return best_div
    if n_pixels >= 128:
        return min(cap, (n_pixels // 128) * 128)
    return 128


# ----------------------------------------------------------------------------
# Wrapper
# ----------------------------------------------------------------------------
def conv_encoder_forward(x, params, *, out_dtype=jnp.float32):
    """x: (B, Cin, H, W) float32 NCHW. Returns (B, Cout*Hf*Wf) == x.view(B, -1)."""
    B, Cin, H, W = x.shape

    # Four stride-2 / k=1 / pad=0 convs compose to a stride-16 subsample.
    # TODO(synk): host-side strided slice; could become in-kernel row DMA.
    xs = x[:, :, ::16, ::16]                         # (B, Cin, Hf, Wf)
    Hf, Wf = xs.shape[2], xs.shape[3]
    P = Hf * Wf
    xp = xs.reshape(B, Cin, P)                       # NCHW order, pixels last

    Cout = params["w4"].shape[0]

    pix_tile = _pick_pixel_tile(P)
    n_tiles = pl.cdiv(P, pix_tile)                   # ragged tail clipped by Pallas

    weight_args = (params["w1"], params["sh1"],
                   params["w2"], params["sh2"],
                   params["w3"], params["sh3"],
                   params["w4"], params["b4"])

    in_specs = [pl.BlockSpec((None, Cin, pix_tile), lambda b, t: (b, 0, t))]
    for a in weight_args:
        in_specs.append(pl.BlockSpec(a.shape, lambda b, t: (0, 0)))

    out = pl.pallas_call(
        _make_encoder_kernel(Cin),
        out_shape=jax.ShapeDtypeStruct((B, Cout, P), out_dtype),
        grid_spec=pltpu.PrefetchScalarGridSpec(
            num_scalar_prefetch=0,
            grid=(B, n_tiles),
            in_specs=in_specs,
            out_specs=pl.BlockSpec((None, Cout, pix_tile), lambda b, t: (b, 0, t)),
        ),
        compiler_params=pltpu.CompilerParams(
            dimension_semantics=("parallel", "parallel"),
            vmem_limit_bytes=32 * 1024 * 1024),
    )(xp, *weight_args)                              # (B, Cout, P)

    return out.reshape(B, -1)                        # == x.view(batch_size, -1)


# ----------------------------------------------------------------------------
# Deterministic parameter init (shapes from ConvEncoder.__init__).
# Kernel params fold conv-bias + eval-mode BN into (W', shift'); MXU-fed
# weights are pre-cast to bf16 (accumulation in-kernel stays f32).
# ----------------------------------------------------------------------------
def init_params(key, image_channels=1, conv_channels=32):
    dims = [(image_channels, conv_channels // 2),
            (conv_channels // 2, conv_channels),
            (conv_channels, conv_channels * 2),
            (conv_channels * 2, conv_channels * 4)]

    keys = jax.random.split(key, 24)
    ki = 0
    raw, kp = {}, {}
    for idx, (cin, cout) in enumerate(dims, start=1):
        bound = 1.0 / math.sqrt(cin)                 # k=1 -> fan_in = cin
        w = jax.random.uniform(keys[ki], (cout, cin), jnp.float32, -bound, bound); ki += 1
        b = jax.random.uniform(keys[ki], (cout,), jnp.float32, -bound, bound); ki += 1
        raw[f"w{idx}"], raw[f"b{idx}"] = w, b
        if idx <= 3:                                 # blocks 1-3 have BatchNorm
            g = 1.0 + 0.1 * jax.random.normal(keys[ki], (cout,), jnp.float32); ki += 1
            be = 0.1 * jax.random.normal(keys[ki], (cout,), jnp.float32); ki += 1
            m = 0.1 * jax.random.normal(keys[ki], (cout,), jnp.float32); ki += 1
            v = 0.5 + jax.random.uniform(keys[ki], (cout,), jnp.float32); ki += 1
            raw[f"g{idx}"], raw[f"be{idx}"] = g, be
            raw[f"m{idx}"], raw[f"v{idx}"] = m, v
            scale = g * lax.rsqrt(v + _EPS)          # (cout,)
            wf = w * scale[:, None]                  # folded weight (Cout, Cin)
            if idx == 1 and cin <= 8:
                kp["w1"] = wf                        # VPU path stays f32
            else:
                kp[f"w{idx}"] = wf.astype(jnp.bfloat16)
            kp[f"sh{idx}"] = (scale * (b - m) + be).reshape(cout, 1)
        else:
            kp["w4"] = w.astype(jnp.bfloat16)        # (Cout, Cin) bf16 MXU feed
            kp["b4"] = b.reshape(cout, 1)
    return raw, kp


# ----------------------------------------------------------------------------
# Pure-JAX reference (real strided f32 convolutions) for correctness checking.
# ----------------------------------------------------------------------------
def reference_forward(x, raw):
    h = x
    for i in range(1, 5):
        w = raw[f"w{i}"][:, :, None, None]           # (Cout, Cin, 1, 1)
        h = lax.conv_general_dilated(
            h, w, window_strides=(2, 2), padding="VALID",
            dimension_numbers=("NCHW", "OIHW", "NCHW"),
            precision=lax.Precision.HIGHEST)
        h = h + raw[f"b{i}"][None, :, None, None]
        if i <= 3:
            g = raw[f"g{i}"][None, :, None, None]
            be = raw[f"be{i}"][None, :, None, None]
            m = raw[f"m{i}"][None, :, None, None]
            v = raw[f"v{i}"][None, :, None, None]
            h = (h - m) / jnp.sqrt(v + _EPS) * g + be
            h = jnp.maximum(h, 0.0)
    return h.reshape(h.shape[0], -1)


if __name__ == "__main__":
    key = jax.random.PRNGKey(0)
    fwd = jax.jit(conv_encoder_forward, static_argnames=("out_dtype",))

    # (B, C, H, W, conv_channels):
    #  - small grayscale case (single tile much larger than the 4-pixel output)
    #  - multi-channel case whose pixel count exactly fills one 128 tile
    #  - non-divisible pixel count exercising the ragged (clipped) last block
    test_cases = [(2, 1, 32, 32, 32),
                  (2, 3, 256, 128, 32),
                  (2, 3, 160, 224, 16)]

    for B, C, H, W, conv_channels in test_cases:
        kx, kparam, key = jax.random.split(key, 3)
        x = jax.random.normal(kx, (B, C, H, W), jnp.float32)
        raw, kernel_params = init_params(kparam, image_channels=C,
                                         conv_channels=conv_channels)

        out = fwd(x, kernel_params)
        out = jax.block_until_ready(out)

        ref = reference_forward(x, raw)
        hf, wf = -(-H // 16), -(-W // 16)
        expected_shape = (B, conv_channels * 4 * hf * wf)
        assert out.shape == expected_shape, (out.shape, expected_shape)
        assert ref.shape == expected_shape, (ref.shape, expected_shape)

        # bf16 MXU feeds => compare with bf16-appropriate tolerances plus a
        # tight relative-L2 check that would catch any structural bug.
        if not jnp.allclose(out, ref, rtol=5e-2, atol=5e-2):
            raise AssertionError(
                f"Pallas kernel output mismatch vs JAX reference for {(B, C, H, W)}")
        rel_l2 = jnp.linalg.norm(out - ref) / (jnp.linalg.norm(ref) + 1e-12)
        if not (rel_l2 < 2e-2):
            raise AssertionError(
                f"Relative L2 error too large ({float(rel_l2):.4e}) for {(B, C, H, W)}")

    print("KERNEL_OK")
</pallas_src>

<mosaic_0001>
module attributes {stable_mosaic.version = 11 : i64} {
  func.func @kernel(%arg0: i32, %arg1: i32, %arg2: memref<1x1x128xf32, #tpu.memory_space<vmem>>, %arg3: memref<16x1xf32, #tpu.memory_space<vmem>>, %arg4: memref<16x1xf32, #tpu.memory_space<vmem>>, %arg5: memref<32x16xbf16, #tpu.memory_space<vmem>>, %arg6: memref<32x1xf32, #tpu.memory_space<vmem>>, %arg7: memref<64x32xbf16, #tpu.memory_space<vmem>>, %arg8: memref<64x1xf32, #tpu.memory_space<vmem>>, %arg9: memref<128x64xbf16, #tpu.memory_space<vmem>>, %arg10: memref<128x1xf32, #tpu.memory_space<vmem>>, %arg11: memref<1x128x128xf32, #tpu.memory_space<vmem>>) attributes {dimension_semantics = [#tpu.dimension_semantics<parallel>, #tpu.dimension_semantics<parallel>], iteration_bounds = array<i64: 2, 1>, scalar_prefetch = 0 : i64, scratch_operands = 0 : i64, tpu.core_type = #tpu.core_type<tc>, window_params = [{transform_indices = @transform_0, window_bounds = array<i64: 1, 1, 128>}, {pipeline_mode = #tpu.pipeline_mode<synchronous>, transform_indices = @transform_1, window_bounds = array<i64: 16, 1>}, {pipeline_mode = #tpu.pipeline_mode<synchronous>, transform_indices = @transform_2, window_bounds = array<i64: 16, 1>}, {pipeline_mode = #tpu.pipeline_mode<synchronous>, transform_indices = @transform_3, window_bounds = array<i64: 32, 16>}, {pipeline_mode = #tpu.pipeline_mode<synchronous>, transform_indices = @transform_4, window_bounds = array<i64: 32, 1>}, {pipeline_mode = #tpu.pipeline_mode<synchronous>, transform_indices = @transform_5, window_bounds = array<i64: 64, 32>}, {pipeline_mode = #tpu.pipeline_mode<synchronous>, transform_indices = @transform_6, window_bounds = array<i64: 64, 1>}, {pipeline_mode = #tpu.pipeline_mode<synchronous>, transform_indices = @transform_7, window_bounds = array<i64: 128, 64>}, {pipeline_mode = #tpu.pipeline_mode<synchronous>, transform_indices = @transform_8, window_bounds = array<i64: 128, 1>}, {transform_indices = @transform_9, window_bounds = array<i64: 1, 128, 128>}]} {
    %c0 = arith.constant 0 : index
    %c0_0 = arith.constant 0 : index
    %c0_1 = arith.constant 0 : index
    %0 = vector.load %arg2[%c0, %c0_0, %c0_1] : memref<1x1x128xf32, #tpu.memory_space<vmem>>, vector<1x1x128xf32>
    %1 = vector.shape_cast %0 : vector<1x1x128xf32> to vector<1x128xf32>
    %c0_2 = arith.constant 0 : index
    %c0_3 = arith.constant 0 : index
    %2 = vector.load %arg3[%c0_2, %c0_3] : memref<16x1xf32, #tpu.memory_space<vmem>>, vector<16x1xf32>
    %3 = vector.broadcast %2 : vector<16x1xf32> to vector<16x128xf32>
    %4 = vector.broadcast %1 : vector<1x128xf32> to vector<16x128xf32>
    %5 = arith.mulf %3, %4 : vector<16x128xf32>
    %c0_4 = arith.constant 0 : index
    %c0_5 = arith.constant 0 : index
    %6 = vector.load %arg4[%c0_4, %c0_5] : memref<16x1xf32, #tpu.memory_space<vmem>>, vector<16x1xf32>
    %7 = vector.broadcast %6 : vector<16x1xf32> to vector<16x128xf32>
    %8 = arith.addf %5, %7 : vector<16x128xf32>
    %cst = arith.constant 0.000000e+00 : f32
    %9 = vector.broadcast %cst : f32 to vector<16x128xf32>
    %10 = arith.maximumf %8, %9 : vector<16x128xf32>
    %c0_6 = arith.constant 0 : index
    %c0_7 = arith.constant 0 : index
    %11 = vector.load %arg5[%c0_6, %c0_7] : memref<32x16xbf16, #tpu.memory_space<vmem>>, vector<32x16xbf16>
    %12 = arith.truncf %10 : vector<16x128xf32> to vector<16x128xbf16>
    %cst_8 = arith.constant dense<0.000000e+00> : vector<32x128xf32>
    %13 = tpu.matmul %11, %12, %cst_8 {dimension_numbers = #tpu.dot_dimension_numbers<[1], [0], [0], [1], [0, 0, 1, 1], [], []>} : vector<32x16xbf16>, vector<16x128xbf16>, vector<32x128xf32> -> vector<32x128xf32>
    %c0_9 = arith.constant 0 : index
    %c0_10 = arith.constant 0 : index
    %14 = vector.load %arg6[%c0_9, %c0_10] : memref<32x1xf32, #tpu.memory_space<vmem>>, vector<32x1xf32>
    %15 = vector.broadcast %14 : vector<32x1xf32> to vector<32x128xf32>
    %16 = arith.addf %13, %15 : vector<32x128xf32>
    %cst_11 = arith.constant 0.000000e+00 : f32
    %17 = vector.broadcast %cst_11 : f32 to vector<32x128xf32>
    %18 = arith.maximumf %16, %17 : vector<32x128xf32>
    %c0_12 = arith.constant 0 : index
    %c0_13 = arith.constant 0 : index
    %19 = vector.load %arg7[%c0_12, %c0_13] : memref<64x32xbf16, #tpu.memory_space<vmem>>, vector<64x32xbf16>
    %20 = arith.truncf %18 : vector<32x128xf32> to vector<32x128xbf16>
    %cst_14 = arith.constant dense<0.000000e+00> : vector<64x128xf32>
    %21 = tpu.matmul %19, %20, %cst_14 {dimension_numbers = #tpu.dot_dimension_numbers<[1], [0], [0], [1], [0, 0, 1, 1], [], []>} : vector<64x32xbf16>, vector<32x128xbf16>, vector<64x128xf32> -> vector<64x128xf32>
    %c0_15 = arith.constant 0 : index
    %c0_16 = arith.constant 0 : index
    %22 = vector.load %arg8[%c0_15, %c0_16] : memref<64x1xf32, #tpu.memory_space<vmem>>, vector<64x1xf32>
    %23 = vector.broadcast %22 : vector<64x1xf32> to vector<64x128xf32>
    %24 = arith.addf %21, %23 : vector<64x128xf32>
    %cst_17 = arith.constant 0.000000e+00 : f32
    %25 = vector.broadcast %cst_17 : f32 to vector<64x128xf32>
    %26 = arith.maximumf %24, %25 : vector<64x128xf32>
    %c0_18 = arith.constant 0 : index
    %c0_19 = arith.constant 0 : index
    %27 = vector.load %arg9[%c0_18, %c0_19] : memref<128x64xbf16, #tpu.memory_space<vmem>>, vector<128x64xbf16>
    %28 = arith.truncf %26 : vector<64x128xf32> to vector<64x128xbf16>
    %cst_20 = arith.constant dense<0.000000e+00> : vector<128x128xf32>
    %29 = tpu.matmul %27, %28, %cst_20 {dimension_numbers = #tpu.dot_dimension_numbers<[1], [0], [0], [1], [0, 0, 1, 1], [], []>} : vector<128x64xbf16>, vector<64x128xbf16>, vector<128x128xf32> -> vector<128x128xf32>
    %c0_21 = arith.constant 0 : index
    %c0_22 = arith.constant 0 : index
    %30 = vector.load %arg10[%c0_21, %c0_22] : memref<128x1xf32, #tpu.memory_space<vmem>>, vector<128x1xf32>
    %31 = vector.broadcast %30 : vector<128x1xf32> to vector<128x128xf32>
    %32 = arith.addf %29, %31 : vector<128x128xf32>
    %c0_23 = arith.constant 0 : index
    %c0_24 = arith.constant 0 : index
    %c0_25 = arith.constant 0 : index
    %33 = vector.load %arg11[%c0_23, %c0_24, %c0_25] : memref<1x128x128xf32, #tpu.memory_space<vmem>>, vector<1x128x128xf32>
    %34 = vector.shape_cast %33 : vector<1x128x128xf32> to vector<128x128xf32>
    %35 = vector.shape_cast %32 : vector<128x128xf32> to vector<1x128x128xf32>
    tpu.vector_store %arg11[%c0_23, %c0_24, %c0_25], %35 {strides = array<i32>} : memref<1x128x128xf32, #tpu.memory_space<vmem>>, vector<1x128x128xf32>,
    return
  }
  func.func @transform_0(%arg0: i32, %arg1: i32) -> (i32, i32, i32) {
    %c0_i32 = arith.constant 0 : i32
    %c0_i32_0 = arith.constant 0 : i32
    return %arg0, %c0_i32, %arg1 : i32, i32, i32
  }
  func.func @transform_1(%arg0: i32, %arg1: i32) -> (i32, i32) {
    %c0_i32 = arith.constant 0 : i32
    %c0_i32_0 = arith.constant 0 : i32
    %c0_i32_1 = arith.constant 0 : i32
    return %c0_i32, %c0_i32_0 : i32, i32
  }
  func.func @transform_2(%arg0: i32, %arg1: i32) -> (i32, i32) {
    %c0_i32 = arith.constant 0 : i32
    %c0_i32_0 = arith.constant 0 : i32
    %c0_i32_1 = arith.constant 0 : i32
    return %c0_i32, %c0_i32_0 : i32, i32
  }
  func.func @transform_3(%arg0: i32, %arg1: i32) -> (i32, i32) {
    %c0_i32 = arith.constant 0 : i32
    %c0_i32_0 = arith.constant 0 : i32
    %c0_i32_1 = arith.constant 0 : i32
    return %c0_i32, %c0_i32_0 : i32, i32
  }
  func.func @transform_4(%arg0: i32, %arg1: i32) -> (i32, i32) {
    %c0_i32 = arith.constant 0 : i32
    %c0_i32_0 = arith.constant 0 : i32
    %c0_i32_1 = arith.constant 0 : i32
    return %c0_i32, %c0_i32_0 : i32, i32
  }
  func.func @transform_5(%arg0: i32, %arg1: i32) -> (i32, i32) {
    %c0_i32 = arith.constant 0 : i32
    %c0_i32_0 = arith.constant 0 : i32
    %c0_i32_1 = arith.constant 0 : i32
    return %c0_i32, %c0_i32_0 : i32, i32
  }
  func.func @transform_6(%arg0: i32, %arg1: i32) -> (i32, i32) {
    %c0_i32 = arith.constant 0 : i32
    %c0_i32_0 = arith.constant 0 : i32
    %c0_i32_1 = arith.constant 0 : i32
    return %c0_i32, %c0_i32_0 : i32, i32
  }
  func.func @transform_7(%arg0: i32, %arg1: i32) -> (i32, i32) {
    %c0_i32 = arith.constant 0 : i32
    %c0_i32_0 = arith.constant 0 : i32
    %c0_i32_1 = arith.constant 0 : i32
    return %c0_i32, %c0_i32_0 : i32, i32
  }
  func.func @transform_8(%arg0: i32, %arg1: i32) -> (i32, i32) {
    %c0_i32 = arith.constant 0 : i32
    %c0_i32_0 = arith.constant 0 : i32
    %c0_i32_1 = arith.constant 0 : i32
    return %c0_i32, %c0_i32_0 : i32, i32
  }
  func.func @transform_9(%arg0: i32, %arg1: i32) -> (i32, i32, i32) {
    %c0_i32 = arith.constant 0 : i32
    %c0_i32_0 = arith.constant 0 : i32
    return %arg0, %c0_i32, %arg1 : i32, i32, i32
  }
}

</mosaic_0001>

<bundles_post_ra>
// kernel: conv_encoder_forward.1
= control target key start
LH: loop header
LB: loop body
LE: loop exit
PB: predicated region body
PF: predicated region fallthrough
CT: control target
= control target key end

     0   :  { %s1256_s30 = smov 0   ;;  %s1258_s10 = smov 0   ;;  %s1467_s0 = inlined_call_operand.vmem [shape: f32[2,1,4], index: 0, kind: input, shape index: {}]   ;;  %s1468_s1 = inlined_call_operand.vmem [shape: f32[16,1], index: 1, kind: input, shape index: {}]   ;;  %s1469_s2 = inlined_call_operand.vmem [shape: f32[16,1], index: 2, kind: input, shape index: {}]   ;;  %s1470_s3 = inlined_call_operand.vmem [shape: bf16[32,16], index: 3, kind: input, shape index: {}]   ;;  %s1471_s4 = inlined_call_operand.vmem [shape: f32[32,1], index: 4, kind: input, shape index: {}]   ;;  %s1472_s5 = inlined_call_operand.vmem [shape: bf16[64,32], index: 5, kind: input, shape index: {}]   ;;  %s1473_s6 = inlined_call_operand.vmem [shape: f32[64,1], index: 6, kind: input, shape index: {}]   ;;  %s1474_s7 = inlined_call_operand.vmem [shape: bf16[128,64], index: 7, kind: input, shape index: {}]   ;;  %s1475_s8 = inlined_call_operand.vmem [shape: f32[128,1], index: 8, kind: input, shape index: {}]   ;;  %s1476_s9 = inlined_call_operand.vmem [shape: f32[2,128,4], index: 9, kind: output, shape index: {}]  }
   0x1   :  { %s1260_s11 = smov 0  }
   0x2 LB: > { %s31_s12 = sadd.s32 1, %s1199_s10  ;;  %p1034_p0 = scmp.ge.s32.totalorder %s1203_s11, 1  ;;  %s1203_s11 = sphi %s1260_s11, %s19_s11   ;;  %s1199_s10 = sphi %s1258_s10, %s1478_s10   ;;  %s1195_s30 = sphi %s1256_s30, %s1477_s30  }
   0x3   : > { %p33_p1 = scmp.ge.s32.totalorder %s31_s12, 2  ;;  %p304_p2 = scmp.lt.s32.totalorder %s1203_s11, 3 }
   0x5   : > { %s1480_s12 = smov (%p33_p1, %s31_s12), 0  ;;  %p305_p3 = pnand %p1034_p0, %p304_p2 }
   0x6   : > { %v380_v0 = vld [vmem:[%s1469_s2] sm:$0xff] (!%p305_p3)  ;;  %v1205_v2 = vmov (!%p305_p3), 0   ;;  %v381_v3 = vld [vmem:[%s1469_s2 + $0x8] sm:$0xff] (!%p305_p3)  ;;  %v404_v7 = vld [vmem:[%s1471_s4 + $0x18] sm:$0xff] (!%p305_p3)  ;;  %vm435_vm0 = vcmask (!%p305_p3), 130048   ;;  %p344_p4 = scmp.lt.s32.totalorder (!%p305_p3), %s1195_s30, 1 }
   0x7   : > { %308 = sbr.rel (%p305_p3) target bundleno = 852 (0x354), region = 56  ;;  %v360_v1 = vld [vmem:[%s1468_s1] sm:$0xff] (!%p305_p3)  ;;  %1166 = vset.pattern.permute.xlu1 (!%p305_p3), %v1205_v2  ;;  %1165 = vset.pattern.permute.xlu0 (!%p305_p3), %v1205_v2  ;;  %v361_v4 = vld [vmem:[%s1468_s1 + $0x8] sm:$0xff] (!%p305_p3)  ;;  %v403_v8 = vld [vmem:[%s1471_s4 + $0x10] sm:$0xff] (!%p305_p3)  ;;  %vm573_vm1 = vcmask (!%p305_p3), 261120   ;;  %vm815_vm2 = vcmask (!%p305_p3), 523264  }
   0x8   : > { %384 = vperm.xlu1 (!%p305_p3), %1166, %v380_v0   ;;  %364 = vperm.xlu0 (!%p305_p3), %1165, %v360_v1   ;;  %v402_v5 = vld [vmem:[%s1471_s4 + $0x8] sm:$0xff] (!%p305_p3)  ;;  %v401_v6 = vld [vmem:[%s1471_s4] sm:$0xff] (!%p305_p3)  ;;  %v508_v12 = vld [vmem:[%s1473_s6 + $0x18] sm:$0xff] (!%p305_p3) }
   0x9   : > { %v506_v9 = vld [vmem:[%s1473_s6 + $0x8] sm:$0xff] (!%p305_p3)  ;;  %v505_v10 = vld [vmem:[%s1473_s6] sm:$0xff] (!%p305_p3)  ;;  %v507_v13 = vld [vmem:[%s1473_s6 + $0x10] sm:$0xff] (!%p305_p3) }
   0xa   : > { %v1167_v11 = vld [vmem:[%s1470_s3] sm:$0xff] (!%p305_p3)   ;;  %v510_v14 = vld [vmem:[%s1473_s6 + $0x28] sm:$0xff] (!%p305_p3)  ;;  %v512_v16 = vld [vmem:[%s1473_s6 + $0x38] sm:$0xff] (!%p305_p3) }
   0xb   : > { %1092 = vmatprep.mubr.msk.bf16.mxu1 (!%p305_p3), %vm435_vm0, %v1167_v11  ;;  %v509_v15 = vld [vmem:[%s1473_s6 + $0x20] sm:$0xff] (!%p305_p3)  ;;  %v511_v17 = vld [vmem:[%s1473_s6 + $0x30] sm:$0xff] (!%p305_p3)  ;;  %v680_v18 = vld [vmem:[%s1475_s8 + $0x8] sm:$0xff] (!%p305_p3) }
   0xc   : > { %389 = vperm.xlu1 (!%p305_p3), %1166, %v381_v3   ;;  %369 = vperm.xlu0 (!%p305_p3), %1165, %v361_v4   ;;  %v679_v19 = vld [vmem:[%s1475_s8] sm:$0xff] (!%p305_p3)  ;;  %v682_v20 = vld [vmem:[%s1475_s8 + $0x18] sm:$0xff] (!%p305_p3)  ;;  %v681_v21 = vld [vmem:[%s1475_s8 + $0x10] sm:$0xff] (!%p305_p3) }
   0xd   : > { %v684_v22 = vld [vmem:[%s1475_s8 + $0x28] sm:$0xff] (!%p305_p3)  ;;  %v683_v23 = vld [vmem:[%s1475_s8 + $0x20] sm:$0xff] (!%p305_p3)  ;;  %v686_v24 = vld [vmem:[%s1475_s8 + $0x38] sm:$0xff] (!%p305_p3) }
   0xe   : > { %v685_v25 = vld [vmem:[%s1475_s8 + $0x30] sm:$0xff]  ;;  %v688_v26 = vld [vmem:[%s1475_s8 + $0x48] sm:$0xff]  ;;  %v687_v27 = vld [vmem:[%s1475_s8 + $0x40] sm:$0xff]  ;;  %s1482_s30 = smov (!%p344_p4, %s1195_s30), 1 }
   0xf   : > { %v690_v28 = vld [vmem:[%s1475_s8 + $0x58] sm:$0xff]  ;;  %v689_v29 = vld [vmem:[%s1475_s8 + $0x50] sm:$0xff]  ;;  %v692_v30 = vld [vmem:[%s1475_s8 + $0x68] sm:$0xff]  ;;  %s349_s13 = scalar_lea.vmem %s1467_s0, %s1482_s30  ;;  %s1068_s23 = sshll.u32 %s1482_s30, 7 }
  0x10   : > { %412 = vperm.xlu1 %1166, %v402_v5   ;;  %407 = vperm.xlu0 %1165, %v401_v6   ;;  %v691_v31 = vld [vmem:[%s1475_s8 + $0x60] sm:$0xff]  ;;  %v694_v32 = vld [vmem:[%s1475_s8 + $0x78] sm:$0xff]  ;;  %v693_v33 = vld [vmem:[%s1475_s8 + $0x70] sm:$0xff]  ;;  %s1440_s26 = scalar_lea.vmem %s1476_s9, %s1068_s23 }
  0x11   : > { %v1037_v34 = vld [vmem:[%s349_s13] ss:$0 sm:$0xff]  ;;  %v1168_v46 = vld [vmem:[%s1470_s3 + $0x8] sm:$0xff]   ;;  %v1171_v3 = vld [vmem:[%s1472_s5 + $0x10] sm:$0xff]  }
  0x12   : > { %v1169_v47 = vld [vmem:[%s1472_s5] sm:$0xff]   ;;  %v1170_v2 = vld [vmem:[%s1472_s5 + $0x8] sm:$0xff]   ;;  %v1172_v4 = vld [vmem:[%s1472_s5 + $0x18] sm:$0xff]  }
  0x13   : > { %v1173_v5 = vld [vmem:[%s1474_s7] sm:$0xff]   ;;  %v1174_v6 = vld [vmem:[%s1474_s7 + $0x30] sm:$0xff]  }
  0x14   : > { %422 = vperm.xlu1 %1166, %v404_v7   ;;  %417 = vperm.xlu0 %1165, %v403_v8  }
  0x15   : > { %1116 = vmatprep.mubr.msk.bf16.mxu0 %vm815_vm2, %v1173_v5 }
  0x18   : > { %520 = vperm.xlu1 %1166, %v506_v9   ;;  %515 = vperm.xlu0 %1165, %v505_v10  }
  0x1c   : > { %530 = vperm.xlu1 %1166, %v508_v12   ;;  %525 = vperm.xlu0 %1165, %v507_v13  }
  0x20   : > { %540 = vperm.xlu1 %1166, %v510_v14   ;;  %535 = vperm.xlu0 %1165, %v509_v15  }
  0x24   : > { %550 = vperm.xlu1 %1166, %v512_v16   ;;  %545 = vperm.xlu0 %1165, %v511_v17  }
  0x28   : > { %702 = vperm.xlu1 %1166, %v680_v18   ;;  %697 = vperm.xlu0 %1165, %v679_v19  }
  0x2c   : > { %712 = vperm.xlu1 %1166, %v682_v20   ;;  %707 = vperm.xlu0 %1165, %v681_v21  }
  0x30   : > { %722 = vperm.xlu1 %1166, %v684_v22   ;;  %717 = vperm.xlu0 %1165, %v683_v23  }
  0x34   : > { %732 = vperm.xlu1 %1166, %v686_v24   ;;  %727 = vperm.xlu0 %1165, %v685_v25  }
  0x38   : > { %742 = vperm.xlu1 %1166, %v688_v26   ;;  %737 = vperm.xlu0 %1165, %v687_v27  }
  0x3c   : > { %752 = vperm.xlu1 %1166, %v690_v28   ;;  %747 = vperm.xlu0 %1165, %v689_v29  }
  0x40   : > { %762 = vperm.xlu1 %1166, %v692_v30   ;;  %757 = vperm.xlu0 %1165, %v691_v31  }
  0x44   : > { %772 = vperm.xlu1 %1166, %v694_v32   ;;  %767 = vperm.xlu0 %1165, %v693_v33  }
  0x87   : > { %v385_v35 = vpop.permute.xlu1 %384  ;;  %v365_v36 = vpop.permute.xlu0 %364 }
  0x88   : > { %v378_v37 = vmul.f32 %v1037_v34, %v365_v36 }
  0x8a   : > { %v392_v39 = vadd.f32 %v385_v35, %v378_v37 }
  0x8b   : > { %v370_v38 = vpop.permute.xlu0 %369  ;;  %v390_v41 = vpop.permute.xlu1 %389 }
  0x8c   : > { %v379_v40 = vmul.f32 %v1037_v34, %v370_v38  ;;  %v394_v43 = vmax.f32 %v392_v39, 0.0 }
  0x8e   : > { %v393_v42 = vadd.f32 %v390_v41, %v379_v40 }
  0x8f   : > { %v408_v48 = vpop.permute.xlu0 %407  ;;  %v413_v49 = vpop.permute.xlu1 %412 }
  0x90   : > { %v395_v44 = vmax.f32 %v393_v42, 0.0 }
  0x92   : > { %v400_v45 = vpack.c.bf16 %v395_v44, %v394_v43  ;;  %v1175_v43 = vld [vmem:[%s1474_s7 + $0x8] sm:$0xff]   ;;  %v1176_v44 = vld [vmem:[%s1474_s7 + $0x38] sm:$0xff]  }
  0x93   : > { %v418_v50 = vpop.permute.xlu0 %417  ;;  %v423_v54 = vpop.permute.xlu1 %422 }
  0x94   : > { %1090 = vmatprep.subr.bf16.mxu1 %v400_v45 }
  0x95   : > { %1091 = vmatpush3.bf16.msra.mxu1 %v400_v45  ;;  %v1177_v45 = vld [vmem:[%s1474_s7 + $0x10] sm:$0xff]  }
  0x97   : > { %v516_v7 = vpop.permute.xlu0 %515  ;;  %v521_v8 = vpop.permute.xlu1 %520 }
  0x98   : > { %1093 = vmatmul.mubr.msk.bf16.vlgmr.msra.gmra.mrb[0].mxu1 %vm435_vm0, %v1168_v46  ;;  %v1178_v46 = vld [vmem:[%s1474_s7 + $0x18] sm:$0xff]  }
  0x99   : > { %1100 = vmatprep.mubr.msk.bf16.mxu1 %vm573_vm1, %v1169_v47  ;;  %v1179_v47 = vld [vmem:[%s1474_s7 + $0x20] sm:$0xff]  }
  0x9b   : > { %v526_v9 = vpop.permute.xlu0 %525  ;;  %v531_v10 = vpop.permute.xlu1 %530 }
  0x9f   : > { %v536_v14 = vpop.permute.xlu0 %535  ;;  %v541_v19 = vpop.permute.xlu1 %540 }
  0xa3   : > { %v546_v26 = vpop.permute.xlu0 %545  ;;  %v551_v31 = vpop.permute.xlu1 %550 }
 0x16b   : > { %v1094_v51 = vpop.f32.mrb[0].mxu1 }
 0x16c   : > { %v485_v52 = vadd.f32 %v1094_v51, %v418_v50  ;;  %v476_v53 = vpop.f32.mrb[1].mxu1  ;;  %v698_v50 = vpop.permute.xlu0 %697 }
 0x16d   : > { %v477_v55 = vadd.f32 %v476_v53, %v408_v48  ;;  %v1095_v56 = vpop.f32.mrb[2].mxu1  ;;  %v1180_v48 = vld [vmem:[%s1474_s7 + $0x28] sm:$0xff]  }
 0x16e   : > { %v488_v57 = vadd.f32 %v1095_v56, %v423_v54  ;;  %v479_v58 = vpop.f32.mrb[3].mxu1  ;;  %v493_v60 = vmax.f32 %v485_v52, 0.0 }
 0x16f   : > { %v480_v59 = vadd.f32 %v479_v58, %v413_v49  ;;  %v491_v62 = vmax.f32 %v477_v55, 0.0  ;;  %v703_v49 = vpop.permute.xlu1 %702 }
 0x170   : > { %v494_v61 = vmax.f32 %v488_v57, 0.0  ;;  %v708_v52 = vpop.permute.xlu0 %707 }
 0x171   : > { %v492_v63 = vmax.f32 %v480_v59, 0.0 }
 0x172   : > { %v504_v0 = vpack.c.bf16 %v494_v61, %v493_v60 }
 0x173   : > { %v503_v1 = vpack.c.bf16 %v492_v63, %v491_v62  ;;  %v713_v51 = vpop.permute.xlu1 %712 }
 0x174   : > { %v718_v54 = vpop.permute.xlu0 %717 }
 0x175   : > { %1096 = vmatprep.subr.bf16.mxu1 %v503_v1 }
 0x176   : > { %1097 = vmatpush3.bf16.msra.mxu1 %v503_v1 }
 0x177   : > { %1098 = vmatprep.subr.bf16.mxu1 %v504_v0  ;;  %v723_v53 = vpop.permute.xlu1 %722 }
 0x178   : > { %v728_v56 = vpop.permute.xlu0 %727 }
 0x17a   : > { %1099 = vmatpush3.bf16.msra.mxu1 %v504_v0 }
 0x17b   : > { %v733_v55 = vpop.permute.xlu1 %732 }
 0x17c   : > { %v738_v58 = vpop.permute.xlu0 %737 }
 0x17d   : > { %1101 = vmatmul.mubr.msk.bf16.vlgmr.msra.gmra.mrb[4].mxu1 %vm573_vm1, %v1170_v2 }
 0x17e   : > { %1104 = vmatprep.mubr.msk.bf16.mxu1 %vm573_vm1, %v1171_v3 }
 0x17f   : > { %v743_v57 = vpop.permute.xlu1 %742 }
 0x180   : > { %v748_v60 = vpop.permute.xlu0 %747 }
 0x183   : > { %v753_v59 = vpop.permute.xlu1 %752 }
 0x184   : > { %v758_v62 = vpop.permute.xlu0 %757 }
 0x185   : > { %1105 = vmatmul.mubr.msk.bf16.gmra.mrb[8].mxu1 %vm573_vm1, %v1172_v4 }
 0x186   : > { %1128 = vmatprep.mubr.msk.bf16.mxu1 %vm815_vm2, %v1174_v6 }
 0x187   : > { %v763_v61 = vpop.permute.xlu1 %762 }
 0x188   : > { %v768_v0 = vpop.permute.xlu0 %767 }
 0x18b   : > { %v773_v63 = vpop.permute.xlu1 %772 }
 0x250   : > { %v1102_v11 = vpop.f32.mrb[4].mxu1 }
 0x251   : > { %v629_v12 = vadd.f32 %v1102_v11, %v526_v9  ;;  %v620_v13 = vpop.f32.mrb[5].mxu1 }
 0x252   : > { %v621_v15 = vadd.f32 %v620_v13, %v516_v7  ;;  %v1103_v16 = vpop.f32.mrb[6].mxu1 }
 0x253   : > { %v632_v17 = vadd.f32 %v1103_v16, %v531_v10  ;;  %v623_v18 = vpop.f32.mrb[7].mxu1  ;;  %v653_v21 = vmax.f32 %v629_v12, 0.0 }
 0x254   : > { %v624_v20 = vadd.f32 %v623_v18, %v521_v8  ;;  %v651_v23 = vmax.f32 %v621_v15, 0.0 }
 0x255   : > { %v654_v22 = vmax.f32 %v632_v17, 0.0 }
 0x256   : > { %v652_v24 = vmax.f32 %v624_v20, 0.0 }
 0x257   : > { %v676_v25 = vpack.c.bf16 %v654_v22, %v653_v21 }
 0x258   : > { %v675_v27 = vpack.c.bf16 %v652_v24, %v651_v23  ;;  %v1106_v28 = vpop.f32.mrb[8].mxu1 }
 0x259   : > { %v645_v29 = vadd.f32 %v1106_v28, %v546_v26  ;;  %v636_v30 = vpop.f32.mrb[9].mxu1 }
 0x25a   : > { %v637_v32 = vadd.f32 %v636_v30, %v536_v14  ;;  %v1107_v33 = vpop.f32.mrb[10].mxu1  ;;  %1108 = vmatprep.subr.bf16.mxu0 %v675_v27  ;;  %1132 = vmatprep.subr.bf16.mxu1 %v675_v27 }
 0x25b   : > { %v648_v34 = vadd.f32 %v1107_v33, %v551_v31  ;;  %v639_v35 = vpop.f32.mrb[11].mxu1  ;;  %1109 = vmatpush3.bf16.msra.mxu0 %v675_v27  ;;  %1136 = vmatpush3.bf16.msra.mxu1 %v675_v27  ;;  %v657_v37 = vmax.f32 %v645_v29, 0.0 }
 0x25c   : > { %v640_v36 = vadd.f32 %v639_v35, %v541_v19  ;;  %1110 = vmatprep.subr.bf16.mxu0 %v676_v25  ;;  %1133 = vmatprep.subr.bf16.mxu1 %v676_v25  ;;  %v655_v39 = vmax.f32 %v637_v32, 0.0 }
 0x25d   : > { %v658_v38 = vmax.f32 %v648_v34, 0.0 }
 0x25e   : > { %v656_v40 = vmax.f32 %v640_v36, 0.0 }
 0x25f   : > { %v678_v41 = vpack.c.bf16 %v658_v38, %v657_v37  ;;  %1111 = vmatpush3.bf16.msra.mxu0 %v676_v25  ;;  %1137 = vmatpush3.bf16.msra.mxu1 %v676_v25 }
 0x260   : > { %v677_v42 = vpack.c.bf16 %v656_v40, %v655_v39 }
 0x262   : > { %1112 = vmatprep.subr.bf16.mxu0 %v677_v42  ;;  %1134 = vmatprep.subr.bf16.mxu1 %v677_v42 }
 0x263   : > { %1113 = vmatpush3.bf16.msra.mxu0 %v677_v42  ;;  %1138 = vmatpush3.bf16.msra.mxu1 %v677_v42 }
 0x264   : > { %1114 = vmatprep.subr.bf16.mxu0 %v678_v41  ;;  %1135 = vmatprep.subr.bf16.mxu1 %v678_v41 }
 0x267   : > { %1115 = vmatpush3.bf16.msra.mxu0 %v678_v41  ;;  %1139 = vmatpush3.bf16.msra.mxu1 %v678_v41 }
 0x26a   : > { %1117 = vmatmul.mubr.msk.bf16.vlgmr.msra.gmra.mrb[0].mxu0 %vm815_vm2, %v1175_v43  ;;  %1129 = vmatmul.mubr.msk.bf16.vlgmr.msra.gmra.mrb[12].mxu1 %vm815_vm2, %v1176_v44 }
 0x26b   : > { %1120 = vmatprep.mubr.msk.bf16.mxu0 %vm815_vm2, %v1177_v45 }
 0x272   : > { %1121 = vmatmul.mubr.msk.bf16.gmra.mrb[4].mxu0 %vm815_vm2, %v1178_v46 }
 0x273   : > { %1124 = vmatprep.mubr.msk.bf16.mxu0 %vm815_vm2, %v1179_v47 }
 0x27a   : > { %1125 = vmatmul.mubr.msk.bf16.gmra.mrb[8].mxu0 %vm815_vm2, %v1180_v48 }
 0x33d   : > { %v1118_v1 = vpop.f32.mrb[0].mxu0  ;;  %v1130_v2 = vpop.f32.mrb[12].mxu1 }
 0x33e   : > { %v883_v3 = vadd.f32 %v1118_v1, %v708_v52  ;;  %v931_v4 = vadd.f32 %v1130_v2, %v768_v0  ;;  %v874_v5 = vpop.f32.mrb[1].mxu0  ;;  %v922_v6 = vpop.f32.mrb[13].mxu1 }
 0x33f   : > { %v875_v7 = vadd.f32 %v874_v5, %v698_v50  ;;  %v923_v8 = vadd.f32 %v922_v6, %v758_v62  ;;  %v1119_v9 = vpop.f32.mrb[2].mxu0  ;;  %v1131_v10 = vpop.f32.mrb[14].mxu1 }
 0x340   : > { %939 = vst [vmem:[%s1440_s26 + $0x10] sm:$0xff] %v883_v3  ;;  %951 = vst [vmem:[%s1440_s26 + $0x70] sm:$0xff] %v931_v4  ;;  %v886_v11 = vadd.f32 %v1119_v9, %v713_v51  ;;  %v934_v12 = vadd.f32 %v1131_v10, %v773_v63  ;;  %v877_v13 = vpop.f32.mrb[3].mxu0  ;;  %v925_v14 = vpop.f32.mrb[15].mxu1 }
 0x341   : > { %937 = vst [vmem:[%s1440_s26] sm:$0xff] %v875_v7  ;;  %949 = vst [vmem:[%s1440_s26 + $0x60] sm:$0xff] %v923_v8  ;;  %v878_v15 = vadd.f32 %v877_v13, %v703_v49  ;;  %v926_v16 = vadd.f32 %v925_v14, %v763_v61 }
 0x342   : > { %940 = vst [vmem:[%s1440_s26 + $0x18] sm:$0xff] %v886_v11  ;;  %952 = vst [vmem:[%s1440_s26 + $0x78] sm:$0xff] %v934_v12 }
 0x343   : > { %938 = vst [vmem:[%s1440_s26 + $0x8] sm:$0xff] %v878_v15  ;;  %950 = vst [vmem:[%s1440_s26 + $0x68] sm:$0xff] %v926_v16 }
 0x345   : > { %v1122_v17 = vpop.f32.mrb[4].mxu0 }
 0x346   : > { %v899_v18 = vadd.f32 %v1122_v17, %v728_v56  ;;  %v890_v19 = vpop.f32.mrb[5].mxu0 }
 0x347   : > { %v891_v20 = vadd.f32 %v890_v19, %v718_v54  ;;  %v1123_v21 = vpop.f32.mrb[6].mxu0 }
 0x348   : > { %943 = vst [vmem:[%s1440_s26 + $0x30] sm:$0xff] %v899_v18  ;;  %v902_v22 = vadd.f32 %v1123_v21, %v733_v55  ;;  %v893_v23 = vpop.f32.mrb[7].mxu0 }
 0x349   : > { %941 = vst [vmem:[%s1440_s26 + $0x20] sm:$0xff] %v891_v20  ;;  %v894_v24 = vadd.f32 %v893_v23, %v723_v53 }
 0x34a   : > { %944 = vst [vmem:[%s1440_s26 + $0x38] sm:$0xff] %v902_v22 }
 0x34b   : > { %942 = vst [vmem:[%s1440_s26 + $0x28] sm:$0xff] %v894_v24 }
 0x34d   : > { %v1126_v25 = vpop.f32.mrb[8].mxu0 }
 0x34e   : > { %v915_v26 = vadd.f32 %v1126_v25, %v748_v60  ;;  %v906_v27 = vpop.f32.mrb[9].mxu0 }
 0x34f   : > { %v907_v28 = vadd.f32 %v906_v27, %v738_v58  ;;  %v1127_v29 = vpop.f32.mrb[10].mxu0 }
 0x350   : > { %947 = vst [vmem:[%s1440_s26 + $0x50] sm:$0xff] %v915_v26  ;;  %v918_v30 = vadd.f32 %v1127_v29, %v753_v59  ;;  %v909_v31 = vpop.f32.mrb[11].mxu0 }
 0x351   : > { %945 = vst [vmem:[%s1440_s26 + $0x40] sm:$0xff] %v907_v28  ;;  %v910_v32 = vadd.f32 %v909_v31, %v743_v57 }
 0x352   : > { %948 = vst [vmem:[%s1440_s26 + $0x58] sm:$0xff] %v918_v30 }
 0x353   : > { %946 = vst [vmem:[%s1440_s26 + $0x48] sm:$0xff] %v910_v32 }
 0x354 PF: > { %s19_s11 = sadd.s32 1, %s1203_s11   ;;  %s1477_s30 = smov %s1199_s10 }
 0x355   : > { %p16_p5 = scmp.ge.s32.totalorder %s19_s11, 4   ;;  %s1478_s10 = smov %s1480_s12 }
 0x357   :  { %18 = sbr.rel (!%p16_p5) target bundleno = 2 (0x2), region = 86 }

</bundles_post_ra>
